<compile_context>
chip_gen: v5e
topology: v5e:2x2
jax: 0.10.0
libtpu: 0.0.40
codegen_flags: <defaults>
</compile_context>

<pallas_src>
import numpy as np
import jax
import jax.numpy as jnp
from jax.experimental import pallas as pl
from jax.experimental.pallas import tpu as pltpu


def _ffparser_kernel(x_ref, fh_ref, gr_ref, gi_ref, wr_ref, wi_ref, o_ref):
    # x_ref : (H, L)   L = C_blk*B*W, lanes ordered (channel, batch, w)
    # fh_ref: (2H, H)  [[Fh_r],[Fh_i]] with the H-axis ifftshift folded in
    # gr/gi : (L, L)   blockdiag over the C_blk*B images of Fw_r / Fw_i
    #                  (W-axis ifftshift folded into the columns)
    # wr/wi : (H, L)   pre-shifted, B-tiled complex-weight slabs
    # o_ref : (H, L)
    H = fh_ref.shape[1]
    x = x_ref[...]

    # ---- stage 1: DFT along H (sublane axis); real input -> [Yr; Yi] --------
    y = jnp.dot(fh_ref[...], x, preferred_element_type=jnp.float32)      # (2H, L)

    # ---- stage 2: DFT along W (lane axis) via block-diag right-multiplies ---
    pr = jnp.dot(y, gr_ref[...], preferred_element_type=jnp.float32)     # [Yr@Gr; Yi@Gr]
    pi = jnp.dot(y, gi_ref[...], preferred_element_type=jnp.float32)     # [Yr@Gi; Yi@Gi]
    zr = pr[:H, :] - pi[H:, :]      # Re(FFT2), aligned sublane slices (H % 8 == 0)
    zi = pi[:H, :] + pr[H:, :]      # Im(FFT2)

    # ---- complex weight multiply + magnitude, fully lane-dense ---------------
    wr = wr_ref[...]
    wi = wi_ref[...]
    ar = zr * wr - zi * wi
    ai = zr * wi + zi * wr
    o_ref[...] = jnp.sqrt(ar * ar + ai * ai)                             # unmasked store


def _pick_channel_block(B, C, W):
    """Smallest divisor of C whose lane width C_blk*B*W is a multiple of 128."""
    for cb in range(1, C + 1):
        if C % cb == 0 and (cb * B * W) % 128 == 0:
            return cb
    # Fallback: one full-width block (block shape == full array dims is always
    # a legal BlockSpec).  Fine at FFParser scales; for huge C*B*W one would
    # instead split B across a second grid axis.
    return C


def _dft_constants(H, W, n_img):
    """Trace-time numpy constants (f64 angles): stage-1 (2H,H), stage-2 (L,L)."""
    sH, sW = H // 2, W // 2
    u = np.arange(H)
    u_s = (u + sH) % H                                   # ifftshifted output row
    ang_h = 2.0 * np.pi * ((u_s[:, None] * u[None, :]) % H) / H          # [u', h]
    fh = np.concatenate([np.cos(ang_h), -np.sin(ang_h)], axis=0)         # (2H, H)

    v = np.arange(W)
    v_s = (v + sW) % W                                   # ifftshifted output col
    ang_w = 2.0 * np.pi * ((v[:, None] * v_s[None, :]) % W) / W          # [w, v']
    eye = np.eye(n_img)
    gr = np.kron(eye, np.cos(ang_w))                                     # (L, L)
    gi = np.kron(eye, -np.sin(ang_w))
    return fh.astype(np.float32), gr.astype(np.float32), gi.astype(np.float32)


@jax.jit
def ffparser_forward(x, complex_weight):
    """x: (B, C, H, W) float32, complex_weight: (C, H, W, 2) float32."""
    B, C, H, W = x.shape
    assert H == W, "height and width are not equal"
    assert H % 8 == 0, "spatial size must be a multiple of 8 (sublane tiling)"
    sB, sC, sH, sW = B // 2, C // 2, H // 2, W // 2

    cb = _pick_channel_block(B, C, W)           # channels per grid step
    n_blocks = C // cb
    L = cb * B * W                              # lane width per step
    fh, gr, gi = _dft_constants(H, W, cb * B)   # numpy -> baked constants

    # ---- input slab: (H, C*B*W), lanes ordered (c, b, w) ---------------------
    # Batch/channel ifftshift folded into the gather order: output image
    # (b', c') depends only on input image ((b'+sB)%B, (c'+sC)%C), so the roll
    # fuses into this single transpose copy — no activation-sized roll remains.
    xp = jnp.roll(x, shift=(-sB, -sC), axis=(0, 1))
    xs = jnp.transpose(xp, (2, 1, 0, 3)).reshape(H, C * B * W)

    # ---- weight slabs: channel+spatial ifftshift, B-tiled, (H, C*B*W) --------
    w_r = jnp.roll(complex_weight[..., 0], shift=(-sC, -sH, -sW), axis=(0, 1, 2))
    w_i = jnp.roll(complex_weight[..., 1], shift=(-sC, -sH, -sW), axis=(0, 1, 2))

    def _slab(wc):                               # (C, H, W) -> (H, C*B*W)
        wc = jnp.transpose(wc, (1, 0, 2))        # (H, C, W)
        wc = jnp.broadcast_to(wc[:, :, None, :], (H, C, B, W))
        return wc.reshape(H, C * B * W)

    out_slab = pl.pallas_call(
        _ffparser_kernel,
        out_shape=jax.ShapeDtypeStruct((H, C * B * W), jnp.float32),
        grid_spec=pltpu.PrefetchScalarGridSpec(
            num_scalar_prefetch=0,
            grid=(n_blocks,),
            in_specs=[
                pl.BlockSpec((H, L), lambda i: (0, i)),        # x slab (this block)
                pl.BlockSpec((2 * H, H), lambda i: (0, 0)),    # fh (grid-invariant)
                pl.BlockSpec((L, L), lambda i: (0, 0)),        # gr (grid-invariant)
                pl.BlockSpec((L, L), lambda i: (0, 0)),        # gi (grid-invariant)
                pl.BlockSpec((H, L), lambda i: (0, i)),        # weight real slab
                pl.BlockSpec((H, L), lambda i: (0, i)),        # weight imag slab
            ],
            out_specs=pl.BlockSpec((H, L), lambda i: (0, i)),  # lane-dense slab
        ),
        compiler_params=pltpu.CompilerParams(
            dimension_semantics=("parallel",),   # channel blocks are independent
            vmem_limit_bytes=32 * 1024 * 1024),  # per-step footprint << 32 MiB (v7x-safe)
    )(xs, jnp.asarray(fh), jnp.asarray(gr), jnp.asarray(gi),
      _slab(w_r), _slab(w_i))

    # ---- un-stack the lane-dense slab back to NCHW (wrapper-side layout) -----
    return out_slab.reshape(H, C, B, W).transpose(2, 1, 0, 3)


def _reference(x, complex_weight):
    """Pure-JAX reference mirroring the PyTorch/numpy forward."""
    xf = jnp.fft.fftn(x.astype(jnp.complex64), axes=(-2, -1))
    w = complex_weight[..., 0] + 1j * complex_weight[..., 1]
    xf = xf * w
    shifts = tuple(-(d // 2) for d in xf.shape)      # np.fft.ifftshift, all axes
    xf = jnp.roll(xf, shift=shifts, axis=(0, 1, 2, 3))
    return jnp.abs(xf).astype(jnp.float32)


if __name__ == "__main__":
    B, C, H, W = 2, 4, 16, 16

    key = jax.random.PRNGKey(0)
    kx, kw = jax.random.split(key)
    x = jax.random.normal(kx, (B, C, H, W), dtype=jnp.float32)
    # complex_weight ~ randn(dim, h, w, 2) * 0.02  (deterministic init)
    complex_weight = jax.random.normal(kw, (C, H, W, 2), dtype=jnp.float32) * 0.02

    out = jax.block_until_ready(ffparser_forward(x, complex_weight))
    ref = jax.block_until_ready(_reference(x, complex_weight))

    assert out.shape == (B, C, H, W) and out.dtype == jnp.float32
    err = float(jnp.max(jnp.abs(out - ref)))
    assert err < 1e-3, f"mismatch vs FFT reference: {err}"

    print("KERNEL_OK")
</pallas_src>

<mosaic_0001>
module attributes {stable_mosaic.version = 11 : i64} {
  func.func @_ffparser_kernel(%arg0: i32, %arg1: memref<16x128xf32, #tpu.memory_space<vmem>>, %arg2: memref<32x16xf32, #tpu.memory_space<vmem>>, %arg3: memref<128x128xf32, #tpu.memory_space<vmem>>, %arg4: memref<128x128xf32, #tpu.memory_space<vmem>>, %arg5: memref<16x128xf32, #tpu.memory_space<vmem>>, %arg6: memref<16x128xf32, #tpu.memory_space<vmem>>, %arg7: memref<16x128xf32, #tpu.memory_space<vmem>>) attributes {dimension_semantics = [#tpu.dimension_semantics<parallel>], iteration_bounds = array<i64: 1>, scalar_prefetch = 0 : i64, scratch_operands = 0 : i64, tpu.core_type = #tpu.core_type<tc>, window_params = [{transform_indices = @transform_0, window_bounds = array<i64: 16, 128>}, {pipeline_mode = #tpu.pipeline_mode<synchronous>, transform_indices = @transform_1, window_bounds = array<i64: 32, 16>}, {pipeline_mode = #tpu.pipeline_mode<synchronous>, transform_indices = @transform_2, window_bounds = array<i64: 128, 128>}, {pipeline_mode = #tpu.pipeline_mode<synchronous>, transform_indices = @transform_3, window_bounds = array<i64: 128, 128>}, {transform_indices = @transform_4, window_bounds = array<i64: 16, 128>}, {transform_indices = @transform_5, window_bounds = array<i64: 16, 128>}, {transform_indices = @transform_6, window_bounds = array<i64: 16, 128>}]} {
    %c0 = arith.constant 0 : index
    %c0_0 = arith.constant 0 : index
    %0 = vector.load %arg1[%c0, %c0_0] : memref<16x128xf32, #tpu.memory_space<vmem>>, vector<16x128xf32>
    %c0_1 = arith.constant 0 : index
    %c0_2 = arith.constant 0 : index
    %1 = vector.load %arg2[%c0_1, %c0_2] : memref<32x16xf32, #tpu.memory_space<vmem>>, vector<32x16xf32>
    %cst = arith.constant dense<0.000000e+00> : vector<32x128xf32>
    %2 = tpu.matmul %1, %0, %cst {dimension_numbers = #tpu.dot_dimension_numbers<[1], [0], [0], [1], [0, 0, 1, 1], [], []>} : vector<32x16xf32>, vector<16x128xf32>, vector<32x128xf32> -> vector<32x128xf32>
    %c0_3 = arith.constant 0 : index
    %c0_4 = arith.constant 0 : index
    %3 = vector.load %arg3[%c0_3, %c0_4] : memref<128x128xf32, #tpu.memory_space<vmem>>, vector<128x128xf32>
    %cst_5 = arith.constant dense<0.000000e+00> : vector<32x128xf32>
    %4 = tpu.matmul %2, %3, %cst_5 {dimension_numbers = #tpu.dot_dimension_numbers<[1], [0], [0], [1], [0, 0, 1, 1], [], []>} : vector<32x128xf32>, vector<128x128xf32>, vector<32x128xf32> -> vector<32x128xf32>
    %c0_6 = arith.constant 0 : index
    %c0_7 = arith.constant 0 : index
    %5 = vector.load %arg4[%c0_6, %c0_7] : memref<128x128xf32, #tpu.memory_space<vmem>>, vector<128x128xf32>
    %cst_8 = arith.constant dense<0.000000e+00> : vector<32x128xf32>
    %6 = tpu.matmul %2, %5, %cst_8 {dimension_numbers = #tpu.dot_dimension_numbers<[1], [0], [0], [1], [0, 0, 1, 1], [], []>} : vector<32x128xf32>, vector<128x128xf32>, vector<32x128xf32> -> vector<32x128xf32>
    %7 = vector.extract_strided_slice %4 {offsets = [0, 0], sizes = [16, 128], strides = [1, 1]} : vector<32x128xf32> to vector<16x128xf32>
    %8 = vector.extract_strided_slice %6 {offsets = [16, 0], sizes = [16, 128], strides = [1, 1]} : vector<32x128xf32> to vector<16x128xf32>
    %9 = arith.subf %7, %8 : vector<16x128xf32>
    %10 = vector.extract_strided_slice %6 {offsets = [0, 0], sizes = [16, 128], strides = [1, 1]} : vector<32x128xf32> to vector<16x128xf32>
    %11 = vector.extract_strided_slice %4 {offsets = [16, 0], sizes = [16, 128], strides = [1, 1]} : vector<32x128xf32> to vector<16x128xf32>
    %12 = arith.addf %10, %11 : vector<16x128xf32>
    %c0_9 = arith.constant 0 : index
    %c0_10 = arith.constant 0 : index
    %13 = vector.load %arg5[%c0_9, %c0_10] : memref<16x128xf32, #tpu.memory_space<vmem>>, vector<16x128xf32>
    %c0_11 = arith.constant 0 : index
    %c0_12 = arith.constant 0 : index
    %14 = vector.load %arg6[%c0_11, %c0_12] : memref<16x128xf32, #tpu.memory_space<vmem>>, vector<16x128xf32>
    %15 = arith.mulf %9, %13 : vector<16x128xf32>
    %16 = arith.mulf %12, %14 : vector<16x128xf32>
    %17 = arith.subf %15, %16 : vector<16x128xf32>
    %18 = arith.mulf %9, %14 : vector<16x128xf32>
    %19 = arith.mulf %12, %13 : vector<16x128xf32>
    %20 = arith.addf %18, %19 : vector<16x128xf32>
    %21 = arith.mulf %17, %17 : vector<16x128xf32>
    %22 = arith.mulf %20, %20 : vector<16x128xf32>
    %23 = arith.addf %21, %22 : vector<16x128xf32>
    %24 = math.sqrt %23 : vector<16x128xf32>
    %c0_13 = arith.constant 0 : index
    %c0_14 = arith.constant 0 : index
    %25 = vector.load %arg7[%c0_13, %c0_14] : memref<16x128xf32, #tpu.memory_space<vmem>>, vector<16x128xf32>
    tpu.vector_store %arg7[%c0_13, %c0_14], %24 {strides = array<i32>} : memref<16x128xf32, #tpu.memory_space<vmem>>, vector<16x128xf32>,
    return
  }
  func.func @transform_0(%arg0: i32) -> (i32, i32) {
    %c0_i32 = arith.constant 0 : i32
    %c0_i32_0 = arith.constant 0 : i32
    return %c0_i32, %arg0 : i32, i32
  }
  func.func @transform_1(%arg0: i32) -> (i32, i32) {
    %c0_i32 = arith.constant 0 : i32
    %c0_i32_0 = arith.constant 0 : i32
    %c0_i32_1 = arith.constant 0 : i32
    return %c0_i32, %c0_i32_0 : i32, i32
  }
  func.func @transform_2(%arg0: i32) -> (i32, i32) {
    %c0_i32 = arith.constant 0 : i32
    %c0_i32_0 = arith.constant 0 : i32
    %c0_i32_1 = arith.constant 0 : i32
    return %c0_i32, %c0_i32_0 : i32, i32
  }
  func.func @transform_3(%arg0: i32) -> (i32, i32) {
    %c0_i32 = arith.constant 0 : i32
    %c0_i32_0 = arith.constant 0 : i32
    %c0_i32_1 = arith.constant 0 : i32
    return %c0_i32, %c0_i32_0 : i32, i32
  }
  func.func @transform_4(%arg0: i32) -> (i32, i32) {
    %c0_i32 = arith.constant 0 : i32
    %c0_i32_0 = arith.constant 0 : i32
    return %c0_i32, %arg0 : i32, i32
  }
  func.func @transform_5(%arg0: i32) -> (i32, i32) {
    %c0_i32 = arith.constant 0 : i32
    %c0_i32_0 = arith.constant 0 : i32
    return %c0_i32, %arg0 : i32, i32
  }
  func.func @transform_6(%arg0: i32) -> (i32, i32) {
    %c0_i32 = arith.constant 0 : i32
    %c0_i32_0 = arith.constant 0 : i32
    return %c0_i32, %arg0 : i32, i32
  }
}

</mosaic_0001>

<bundles_post_ra>
// kernel: ffparser_forward.1
= control target key start
LH: loop header
LB: loop body
LE: loop exit
PB: predicated region body
PF: predicated region fallthrough
CT: control target
= control target key end

     0   :  { %vm29_vm0 = vcmask 130048   ;;  %s428_s0 = inlined_call_operand.vmem [shape: f32[16,128], index: 0, kind: input, shape index: {}]   ;;  %s429_s1 = inlined_call_operand.vmem [shape: f32[32,16], index: 1, kind: input, shape index: {}]   ;;  %s430_s2 = inlined_call_operand.vmem [shape: f32[128,128], index: 2, kind: input, shape index: {}]   ;;  %s431_s3 = inlined_call_operand.vmem [shape: f32[128,128], index: 3, kind: input, shape index: {}]   ;;  %s432_s4 = inlined_call_operand.vmem [shape: f32[16,128], index: 4, kind: input, shape index: {}]   ;;  %s433_s5 = inlined_call_operand.vmem [shape: f32[16,128], index: 5, kind: input, shape index: {}]   ;;  %s434_s6 = inlined_call_operand.vmem [shape: f32[16,128], index: 6, kind: output, shape index: {}]  }
   0x1   :  { %v24_v0 = vld [vmem:[%s428_s0 + $0x8] sm:$0xff]  ;;  %v23_v1 = vld [vmem:[%s428_s0] sm:$0xff]  ;;  %v86_v3 = vld [vmem:[%s430_s2 + $0x78] sm:$0xff] }
   0x2   :  { %56 = vmatpush.msra.mxu0 %v24_v0  ;;  %v25_v2 = vld [vmem:[%s429_s1] sm:$0xff]  ;;  %v131_v4 = vld [vmem:[%s431_s3 + $0x78] sm:$0xff]  ;;  %v85_v5 = vld [vmem:[%s430_s2 + $0x70] sm:$0xff]  ;;  %87 = vmatpush.msra.mxu1 %v86_v3 }
   0x3   :  { %v130_v6 = vld [vmem:[%s431_s3 + $0x70] sm:$0xff]  ;;  %v84_v7 = vld [vmem:[%s430_s2 + $0x68] sm:$0xff]  ;;  %221 = vmatpush.msra.mxu3 %v86_v3  ;;  %v83_v9 = vld [vmem:[%s430_s2 + $0x60] sm:$0xff]  ;;  %237 = vmatpush.msra.mxu2 %v131_v4 }
   0x4   :  { %57 = vmatpush.msra.mxu0 %v23_v1  ;;  %88 = vmatpush.msra.mxu1 %v85_v5  ;;  %v129_v8 = vld [vmem:[%s431_s3 + $0x68] sm:$0xff]  ;;  %v128_v10 = vld [vmem:[%s431_s3 + $0x60] sm:$0xff]  ;;  %v82_v11 = vld [vmem:[%s430_s2 + $0x58] sm:$0xff] }
   0x5   :  { %217 = vmatmul.msk.f32.vlgmr.msra.gmra.mxu0 %vm29_vm0, %v25_v2  ;;  %222 = vmatpush.msra.mxu3 %v85_v5  ;;  %v26_v12 = vld [vmem:[%s429_s1 + $0x8] sm:$0xff]  ;;  %v127_v13 = vld [vmem:[%s431_s3 + $0x58] sm:$0xff]  ;;  %v81_v14 = vld [vmem:[%s430_s2 + $0x50] sm:$0xff] }
   0x6   :  { %132 = vmatpush.msrb.mxu0 %v131_v4  ;;  %89 = vmatpush.msra.mxu1 %v84_v7  ;;  %v126_v15 = vld [vmem:[%s431_s3 + $0x50] sm:$0xff]  ;;  %v80_v16 = vld [vmem:[%s430_s2 + $0x48] sm:$0xff]  ;;  %v79_v18 = vld [vmem:[%s430_s2 + $0x40] sm:$0xff] }
   0x7   :  { %238 = vmatpush.msra.mxu2 %v130_v6  ;;  %223 = vmatpush.msra.mxu3 %v84_v7  ;;  %v125_v17 = vld [vmem:[%s431_s3 + $0x48] sm:$0xff]  ;;  %v124_v19 = vld [vmem:[%s431_s3 + $0x40] sm:$0xff]  ;;  %v78_v20 = vld [vmem:[%s430_s2 + $0x38] sm:$0xff] }
   0x8   :  { %133 = vmatpush.msrb.mxu0 %v130_v6  ;;  %90 = vmatpush.msra.mxu1 %v83_v9  ;;  %v27_v21 = vld [vmem:[%s429_s1 + $0x10] sm:$0xff]  ;;  %v123_v22 = vld [vmem:[%s431_s3 + $0x38] sm:$0xff]  ;;  %v76_v25 = vld [vmem:[%s430_s2 + $0x28] sm:$0xff] }
   0x9   :  { %239 = vmatpush.msra.mxu2 %v129_v8  ;;  %224 = vmatpush.msra.mxu3 %v83_v9  ;;  %v77_v23 = vld [vmem:[%s430_s2 + $0x30] sm:$0xff]  ;;  %v121_v26 = vld [vmem:[%s431_s3 + $0x28] sm:$0xff]  ;;  %v75_v27 = vld [vmem:[%s430_s2 + $0x20] sm:$0xff] }
   0xa   :  { %134 = vmatpush.msrb.mxu0 %v129_v8  ;;  %91 = vmatpush.msra.mxu1 %v82_v11  ;;  %v122_v24 = vld [vmem:[%s431_s3 + $0x30] sm:$0xff]  ;;  %v120_v28 = vld [vmem:[%s431_s3 + $0x20] sm:$0xff]  ;;  %v74_v29 = vld [vmem:[%s430_s2 + $0x18] sm:$0xff] }
   0xb   :  { %240 = vmatpush.msra.mxu2 %v128_v10  ;;  %225 = vmatpush.msra.mxu3 %v82_v11  ;;  %v28_v30 = vld [vmem:[%s429_s1 + $0x18] sm:$0xff]  ;;  %v73_v32 = vld [vmem:[%s430_s2 + $0x10] sm:$0xff]  ;;  %v72_v34 = vld [vmem:[%s430_s2 + $0x8] sm:$0xff] }
   0xc   :  { %135 = vmatpush.msrb.mxu0 %v128_v10  ;;  %92 = vmatpush.msra.mxu1 %v81_v14  ;;  %v119_v31 = vld [vmem:[%s431_s3 + $0x18] sm:$0xff]  ;;  %v118_v33 = vld [vmem:[%s431_s3 + $0x10] sm:$0xff]  ;;  %v117_v35 = vld [vmem:[%s431_s3 + $0x8] sm:$0xff] }
   0xd   :  { %218 = vmatmul.msk.f32.gmra.mxu0 %vm29_vm0, %v26_v12  ;;  %241 = vmatpush.msra.mxu2 %v127_v13  ;;  %v71_v36 = vld [vmem:[%s430_s2] sm:$0xff]  ;;  %v166_v0 = vld [vmem:[%s432_s4 + $0x8] sm:$0xff] }
   0xe   :  { %136 = vmatpush.msrb.mxu0 %v127_v13  ;;  %93 = vmatpush.msra.mxu1 %v80_v16  ;;  %v116_v37 = vld [vmem:[%s431_s3] sm:$0xff]  ;;  %v168_v1 = vld [vmem:[%s433_s5 + $0x8] sm:$0xff] }
   0xf   :  { %226 = vmatpush.msra.mxu3 %v81_v14  ;;  %242 = vmatpush.msra.mxu2 %v126_v15  ;;  %v165_v47 = vld [vmem:[%s432_s4] sm:$0xff] }
  0x10   :  { %137 = vmatpush.msrb.mxu0 %v126_v15  ;;  %94 = vmatpush.msra.mxu1 %v79_v18  ;;  %v167_v48 = vld [vmem:[%s433_s5] sm:$0xff] }
  0x11   :  { %227 = vmatpush.msra.mxu3 %v80_v16  ;;  %243 = vmatpush.msra.mxu2 %v125_v17 }
  0x12   :  { %138 = vmatpush.msrb.mxu0 %v125_v17  ;;  %95 = vmatpush.msra.mxu1 %v78_v20 }
  0x13   :  { %228 = vmatpush.msra.mxu3 %v79_v18  ;;  %244 = vmatpush.msra.mxu2 %v124_v19 }
  0x14   :  { %139 = vmatpush.msrb.mxu0 %v124_v19  ;;  %96 = vmatpush.msra.mxu1 %v77_v23 }
  0x15   :  { %219 = vmatmul.msk.f32.gmra.mxu0 %vm29_vm0, %v27_v21  ;;  %229 = vmatpush.msra.mxu3 %v78_v20 }
  0x16   :  { %140 = vmatpush.msrb.mxu0 %v123_v22  ;;  %97 = vmatpush.msra.mxu1 %v76_v25 }
  0x17   :  { %245 = vmatpush.msra.mxu2 %v123_v22  ;;  %230 = vmatpush.msra.mxu3 %v77_v23 }
  0x18   :  { %141 = vmatpush.msrb.mxu0 %v122_v24  ;;  %98 = vmatpush.msra.mxu1 %v75_v27 }
  0x19   :  { %246 = vmatpush.msra.mxu2 %v122_v24  ;;  %231 = vmatpush.msra.mxu3 %v76_v25 }
  0x1a   :  { %142 = vmatpush.msrb.mxu0 %v121_v26  ;;  %99 = vmatpush.msra.mxu1 %v74_v29 }
  0x1b   :  { %247 = vmatpush.msra.mxu2 %v121_v26  ;;  %232 = vmatpush.msra.mxu3 %v75_v27 }
  0x1c   :  { %143 = vmatpush.msrb.mxu0 %v120_v28  ;;  %100 = vmatpush.msra.mxu1 %v73_v32 }
  0x1d   :  { %220 = vmatmul.msk.f32.gmra.mxu0 %vm29_vm0, %v28_v30  ;;  %248 = vmatpush.msra.mxu2 %v120_v28 }
  0x1e   :  { %144 = vmatpush.msrb.mxu0 %v119_v31  ;;  %101 = vmatpush.msra.mxu1 %v72_v34 }
  0x1f   :  { %233 = vmatpush.msra.mxu3 %v74_v29  ;;  %249 = vmatpush.msra.mxu2 %v119_v31 }
  0x20   :  { %145 = vmatpush.msrb.mxu0 %v118_v33  ;;  %102 = vmatpush.msra.mxu1 %v71_v36 }
  0x21   :  { %234 = vmatpush.msra.mxu3 %v73_v32  ;;  %250 = vmatpush.msra.mxu2 %v118_v33 }
  0x22   :  { %146 = vmatpush.msrb.mxu0 %v117_v35 }
  0x23   :  { %235 = vmatpush.msra.mxu3 %v72_v34  ;;  %251 = vmatpush.msra.mxu2 %v117_v35 }
  0x24   :  { %147 = vmatpush.msrb.mxu0 %v116_v37 }
  0x25   :  { %236 = vmatpush.msra.mxu3 %v71_v36  ;;  %252 = vmatpush.msra.mxu2 %v116_v37 }
  0x82   :  { %v59_v38 = vpop.f32.mrf.mxu0 }
  0x83   :  { %103 = vmatmul.f32.vlgmr.msra.gmra.mxu1 %v59_v38  ;;  %148 = vmatmul.f32.vlgmr.msrb.gmra.mxu0 %v59_v38 }
  0x8a   :  { %v62_v39 = vpop.f32.mrf.mxu0 }
  0x8b   :  { %106 = vmatmul.f32.vlgmr.msra.gmra.mxu3 %v62_v39  ;;  %151 = vmatmul.f32.vlgmr.msra.gmra.mxu2 %v62_v39 }
  0x92   :  { %v65_v40 = vpop.f32.mrf.mxu0 }
  0x93   :  { %109 = vmatmul.f32.gmra.mxu3 %v65_v40  ;;  %154 = vmatmul.f32.gmra.mxu2 %v65_v40 }
  0x9a   :  { %v68_v41 = vpop.f32.mrf.mxu0 }
  0x9b   :  { %112 = vmatmul.f32.gmra.mxu3 %v68_v41  ;;  %157 = vmatmul.f32.gmra.mxu2 %v68_v41 }
 0x100   :  { %v104_v44 = vpop.f32.mrf.mxu1  ;;  %v149_v45 = vpop.f32.mrf.mxu0 }
 0x10e   :  { %v107_v42 = vpop.f32.mrf.mxu3  ;;  %v152_v43 = vpop.f32.mrf.mxu2 }
 0x116   :  { %v110_v46 = vpop.f32.mrf.mxu3  ;;  %v155_v49 = vpop.f32.mrf.mxu2 }
 0x117   :  { %v163_v50 = vadd.f32 %v149_v45, %v110_v46  ;;  %v161_v51 = vsub.f32 %v104_v44, %v155_v49 }
 0x119   :  { %v171_v52 = vmul.f32 %v167_v48, %v163_v50  ;;  %v177_v53 = vmul.f32 %v165_v47, %v163_v50  ;;  %v169_v54 = vmul.f32 %v165_v47, %v161_v51  ;;  %v175_v55 = vmul.f32 %v167_v48, %v161_v51 }
 0x11b   :  { %v173_v56 = vsub.f32 %v169_v54, %v171_v52  ;;  %v179_v57 = vadd.f32 %v177_v53, %v175_v55 }
 0x11d   :  { %v181_v58 = vmul.f32 %v173_v56, %v173_v56  ;;  %v183_v59 = vmul.f32 %v179_v57, %v179_v57 }
 0x11e   :  { %v113_v60 = vpop.f32.mrf.mxu3  ;;  %v158_v61 = vpop.f32.mrf.mxu2 }
 0x11f   :  { %v185_v62 = vadd.f32 %v183_v59, %v181_v58  ;;  %v164_v63 = vadd.f32 %v152_v43, %v113_v60  ;;  %v162_v2 = vsub.f32 %v107_v42, %v158_v61 }
 0x121   :  { %253 = vrsqrt.f32 %v185_v62  ;;  %v172_v3 = vmul.f32 %v168_v1, %v164_v63  ;;  %v178_v4 = vmul.f32 %v166_v0, %v164_v63  ;;  %v170_v5 = vmul.f32 %v166_v0, %v162_v2 }
 0x122   :  { %v176_v6 = vmul.f32 %v168_v1, %v162_v2  ;;  %vm194_vm1 = vcmp.eq.f32.partialorder %v185_v62, inf  ;;  %v197_v21 = vand.u32 2147483648, %v185_v62  ;;  %vm196_vm2 = vcmp.eq.f32.partialorder %v185_v62, 0.0 }
 0x123   :  { %v174_v7 = vsub.f32 %v170_v5, %v172_v3 }
 0x124   :  { %v180_v8 = vadd.f32 %v178_v4, %v176_v6 }
 0x125   :  { %v182_v9 = vmul.f32 %v174_v7, %v174_v7 }
 0x126   :  { %v184_v10 = vmul.f32 %v180_v8, %v180_v8 }
 0x127   :  { %v254_v11 = vpop.eup %253 }
 0x128   :  { %v188_v12 = vmul.f32 %v254_v11, %v185_v62  ;;  %v186_v13 = vadd.f32 %v184_v10, %v182_v9 }
 0x12a   :  { %v189_v14 = vmul.f32 %v254_v11, %v188_v12  ;;  %255 = vrsqrt.f32 %v186_v13  ;;  %vm206_vm3 = vcmp.eq.f32.partialorder %v186_v13, inf  ;;  %v209_v29 = vand.u32 2147483648, %v186_v13 }
 0x12b   :  { %vm208_vm4 = vcmp.eq.f32.partialorder %v186_v13, 0.0 }
 0x12c   :  { %v190_v15 = vmul.f32 0.5, %v189_v14 }
 0x12e   :  { %v191_v16 = vsub.f32 1.5, %v190_v15 }
 0x130   :  { %v256_v17 = vpop.eup %255  ;;  %v192_v18 = vmul.f32 %v254_v11, %v191_v16 }
 0x131   :  { %v200_v19 = vmul.f32 %v256_v17, %v186_v13 }
 0x132   :  { %v193_v20 = vmul.f32 %v192_v18, %v185_v62 }
 0x133   :  { %v201_v22 = vmul.f32 %v256_v17, %v200_v19 }
 0x134   :  { %v195_v23 = vsel %vm194_vm1, %v185_v62, %v193_v20 }
 0x135   :  { %v198_v24 = vsel %vm196_vm2, %v197_v21, %v195_v23  ;;  %v202_v25 = vmul.f32 0.5, %v201_v22 }
 0x136   :  { %211 = vst [vmem:[%s434_s6] sm:$0xff] %v198_v24 }
 0x137   :  { %v203_v26 = vsub.f32 1.5, %v202_v25 }
 0x139   :  { %v204_v27 = vmul.f32 %v256_v17, %v203_v26 }
 0x13b   :  { %v205_v28 = vmul.f32 %v204_v27, %v186_v13 }
 0x13d   :  { %v207_v30 = vsel %vm206_vm3, %v186_v13, %v205_v28 }
 0x13e   :  { %v210_v31 = vsel %vm208_vm4, %v209_v29, %v207_v30 }
 0x13f   :  { %212 = vst [vmem:[%s434_s6 + $0x8] sm:$0xff] %v210_v31 }

</bundles_post_ra>
